<compile_context>
chip_gen: v5e
topology: v5e:2x2
jax: 0.10.0
libtpu: 0.0.40
codegen_flags: <defaults>
</compile_context>

<pallas_src>
import functools

import jax
import jax.numpy as jnp
from jax.experimental import pallas as pl
from jax.experimental.pallas import tpu as pltpu

_LANE = 128     # feature dims padded to multiples of this (lane-dense)
_SUBLANE = 8    # batch padded to multiples of this


def _round_up(x: int, m: int) -> int:
    return (x + m - 1) // m * m


def _fused_mlp_kernel(x_ref, *refs, n_layers: int):
    """Whole-MLP hot path: chained bf16 MXU matmuls (f32 acc) + f32 bias/ELU."""
    o_ref = refs[-1]
    param_refs = refs[:-1]  # w0, b0, w1, b1, ..., w_{L-1}, b_{L-1}

    h = x_ref[...]                                   # bf16 (tm, in0_pad)
    y = None
    for i in range(n_layers):
        w = param_refs[2 * i][...]                   # bf16 (in_pad, out_pad)
        b = param_refs[2 * i + 1][...]               # f32  (1, out_pad), row-broadcast
        y = jnp.dot(h, w, preferred_element_type=jnp.float32) + b   # f32
        if i < n_layers - 1:
            # ELU (alpha=1, PyTorch default), in f32. Clamp exp arg so the EUP
            # only ever sees y <= 0; the select takes y on the positive branch.
            y = jnp.where(y > 0, y, jnp.exp(jnp.minimum(y, 0.0)) - 1.0)
            h = y.astype(jnp.bfloat16)               # bf16 operand for next MXU pass

    # Final layer result y: (tm, out_pad) f32; only column 0 is real (padded
    # weight/bias columns are exactly 0).  Transpose (XLU) so the useful values
    # are lane-dense and store only 8 sublane rows instead of a (tm,128) slab.
    yt = jnp.transpose(y)                            # (out_pad, tm)
    o_ref[...] = yt[0:_SUBLANE, :].astype(o_ref.dtype)


def init_mlp_params(key, ipt_size, hidden_ns):
    """Deterministic f32 parameter init matching the PyTorch module's layer shapes."""
    dims = [ipt_size] + list(hidden_ns) + [1]
    params = []
    for n_in, n_out in zip(dims[:-1], dims[1:]):
        key, kw, kb = jax.random.split(key, 3)
        bound = 1.0 / jnp.sqrt(jnp.float32(n_in))   # torch.nn.Linear-style bound
        w = jax.random.uniform(kw, (n_in, n_out), jnp.float32, -bound, bound)
        b = jax.random.uniform(kb, (1, n_out), jnp.float32, -bound, bound)
        params.append((w, b))
    return params


def mlp_forward(x, params):
    """Fused forward pass: one pallas_call for all layers (ELU after every layer
    except the last, matching nn.Sequential([Linear, ELU]*k + [Linear]))."""
    batch, ipt_size = x.shape
    n_layers = len(params)

    # ---- padded feature dims (lane-dense) ----
    dims = [ipt_size] + [w.shape[1] for (w, _) in params]
    dims_pad = [_round_up(d, _LANE) for d in dims]
    in0_pad = dims_pad[0]
    max_pad = max(dims_pad)

    # ---- VMEM economics (per-generation budget) ----
    try:
        cap = int(getattr(pltpu.get_tpu_info(), "vmem_capacity_bytes", 64 << 20))
    except Exception:
        cap = 64 << 20                                # conservative: v7x per-TC
    budget = int(cap * 0.8)

    # resident params: bf16 weights + f32 biases (single-buffered)
    params_bytes = sum(dims_pad[i] * dims_pad[i + 1] * 2 + dims_pad[i + 1] * 4
                       for i in range(n_layers))
    # per-batch-row bytes: double-buffered bf16 input tile + f32/bf16 intermediates
    # + tiny transposed output tile
    per_row = 4 * in0_pad + 12 * max_pad + 64

    def fits(t):
        return params_bytes + t * per_row + (2 << 20) <= budget

    # ---- batch tile selection ----
    batch_al = _round_up(batch, _SUBLANE)
    if batch_al <= _LANE:
        tm = batch_al                                 # tiny batch: single small tile
    else:
        candidates = [t for t in (2048, 1024, 512, 256, 128) if fits(t)] or [128]
        best_key, tm = None, candidates[-1]
        for t in candidates:
            n = -(-batch_al // t)
            waste = n * t - batch_al
            # prefer >=2 tiles (both v7x TCs busy), then minimal padding, then bigger tile
            key = (n < 2, waste, -t)
            if best_key is None or key < best_key:
                best_key, tm = key, t
    batch_pad = _round_up(batch_al, tm)
    n_tiles = batch_pad // tm

    # ---- pad + cast operands in the wrapper (exact: pads contribute 0) ----
    x_p = jnp.pad(x, ((0, batch_pad - batch), (0, in0_pad - ipt_size))).astype(jnp.bfloat16)
    padded_params = []
    for i, (w, b) in enumerate(params):
        in_p, out_p = dims_pad[i], dims_pad[i + 1]
        w_p = jnp.pad(w, ((0, in_p - w.shape[0]), (0, out_p - w.shape[1]))).astype(jnp.bfloat16)
        b_p = jnp.pad(b, ((0, 0), (0, out_p - b.shape[1]))).astype(jnp.float32)
        padded_params.extend([w_p, b_p])

    # ---- BlockSpecs ----
    def _build_in_specs(single_buffer_params: bool):
        def resident(shape):
            if single_buffer_params:
                return pl.BlockSpec(shape, lambda i: (0, 0),
                                    pipeline_mode=pl.Buffered(1))
            return pl.BlockSpec(shape, lambda i: (0, 0))
        specs = [pl.BlockSpec((tm, in0_pad), lambda i: (i, 0))]     # batch-tiled input
        for li in range(n_layers):
            in_p, out_p = dims_pad[li], dims_pad[li + 1]
            specs.append(resident((in_p, out_p)))                   # weight (resident)
            specs.append(resident((1, out_p)))                      # bias   (resident)
        return specs

    out_specs = pl.BlockSpec((_SUBLANE, tm), lambda i: (i, 0))

    # ---- explicit VMEM limit ----
    needed = params_bytes + tm * per_row + (4 << 20)
    vmem_limit = int(min(max(needed, 32 << 20), int(cap * 0.9)))

    # ---- advisory cost estimate ----
    flops = sum(2 * batch_pad * dims_pad[i] * dims_pad[i + 1] for i in range(n_layers))
    transcendentals = sum(batch_pad * dims_pad[i + 1] for i in range(n_layers - 1))
    bytes_accessed = (x_p.size * 2
                      + sum(p.size * p.dtype.itemsize for p in padded_params)
                      + n_tiles * _SUBLANE * tm * 4)
    cost = pl.CostEstimate(flops=flops, transcendentals=transcendentals,
                           bytes_accessed=bytes_accessed)

    kernel = functools.partial(_fused_mlp_kernel, n_layers=n_layers)

    def _call(single_buffer_params: bool):
        return pl.pallas_call(
            kernel,
            out_shape=jax.ShapeDtypeStruct((n_tiles * _SUBLANE, tm), jnp.float32),
            grid=(n_tiles,),
            in_specs=_build_in_specs(single_buffer_params),
            out_specs=out_specs,
            compiler_params=pltpu.CompilerParams(
                dimension_semantics=("parallel",),       # batch tiles across TCs (v7x)
                vmem_limit_bytes=vmem_limit,
            ),
            cost_estimate=cost,
        )(x_p, *padded_params)

    try:
        out_rows = _call(True)
    except Exception:
        # Fallback for JAX builds rejecting pipeline_mode=pl.Buffered(1);
        # identical math, just default double-buffered resident params.
        out_rows = _call(False)

    # Row 0 of each tile's (8, tm) output block holds the true width-1 result.
    y = out_rows.reshape(n_tiles, _SUBLANE, tm)[:, 0, :].reshape(batch_pad, 1)
    return y[:batch]


if __name__ == "__main__":
    # Small shapes consistent with the module: batch=8, ipt_size=32, hidden_ns=[64, 32]
    batch = 8
    ipt_size = 32
    hidden_ns = [64, 32]

    key = jax.random.PRNGKey(0)
    key, kx = jax.random.split(key)
    x = jax.random.normal(kx, (batch, ipt_size), jnp.float32)

    params = init_mlp_params(key, ipt_size, hidden_ns)

    out = mlp_forward(x, params)
    out = jax.block_until_ready(out)
    assert out.shape == (batch, 1), out.shape

    # Reference 1: mirrors the kernel arithmetic (bf16 matmul operands, f32 acc,
    # f32 bias/ELU) -> should match tightly.
    ref = x
    for i, (w, b) in enumerate(params):
        ref = jnp.dot(ref.astype(jnp.bfloat16), w.astype(jnp.bfloat16),
                      preferred_element_type=jnp.float32) + b
        if i < len(params) - 1:
            ref = jnp.where(ref > 0, ref, jnp.exp(jnp.minimum(ref, 0.0)) - 1.0)
    assert jnp.allclose(out, ref, atol=1e-3, rtol=1e-3), (
        float(jnp.max(jnp.abs(out - ref))))

    # Reference 2: pure-f32 semantics of the PyTorch module (loose tolerance,
    # accounts for bf16 matmul operands).
    ref32 = x
    for i, (w, b) in enumerate(params):
        ref32 = ref32 @ w + b
        if i < len(params) - 1:
            ref32 = jnp.where(ref32 > 0, ref32, jnp.exp(jnp.minimum(ref32, 0.0)) - 1.0)
    assert jnp.allclose(out, ref32, atol=5e-2, rtol=5e-2), (
        float(jnp.max(jnp.abs(out - ref32))))

    print("KERNEL_OK")
</pallas_src>

<mosaic_0001>
module attributes {stable_mosaic.version = 11 : i64} {
  func.func @_fused_mlp_kernel(%arg0: i32, %arg1: memref<8x128xbf16, #tpu.memory_space<vmem>>, %arg2: memref<128x128xbf16, #tpu.memory_space<vmem>>, %arg3: memref<1x128xf32, #tpu.memory_space<vmem>>, %arg4: memref<128x128xbf16, #tpu.memory_space<vmem>>, %arg5: memref<1x128xf32, #tpu.memory_space<vmem>>, %arg6: memref<128x128xbf16, #tpu.memory_space<vmem>>, %arg7: memref<1x128xf32, #tpu.memory_space<vmem>>, %arg8: memref<8x8xf32, #tpu.memory_space<vmem>>) attributes {dimension_semantics = [#tpu.dimension_semantics<parallel>], iteration_bounds = array<i64: 1>, scalar_prefetch = 0 : i64, scratch_operands = 0 : i64, tpu.core_type = #tpu.core_type<tc>, window_params = [{transform_indices = @transform_0, window_bounds = array<i64: 8, 128>}, {pipeline_mode = #tpu.pipeline_mode<synchronous>, transform_indices = @transform_1, window_bounds = array<i64: 128, 128>}, {pipeline_mode = #tpu.pipeline_mode<synchronous>, transform_indices = @transform_2, window_bounds = array<i64: 1, 128>}, {pipeline_mode = #tpu.pipeline_mode<synchronous>, transform_indices = @transform_3, window_bounds = array<i64: 128, 128>}, {pipeline_mode = #tpu.pipeline_mode<synchronous>, transform_indices = @transform_4, window_bounds = array<i64: 1, 128>}, {pipeline_mode = #tpu.pipeline_mode<synchronous>, transform_indices = @transform_5, window_bounds = array<i64: 128, 128>}, {pipeline_mode = #tpu.pipeline_mode<synchronous>, transform_indices = @transform_6, window_bounds = array<i64: 1, 128>}, {transform_indices = @transform_7, window_bounds = array<i64: 8, 8>}]} {
    %c0 = arith.constant 0 : index
    %c0_0 = arith.constant 0 : index
    %0 = vector.load %arg1[%c0, %c0_0] : memref<8x128xbf16, #tpu.memory_space<vmem>>, vector<8x128xbf16>
    %c0_1 = arith.constant 0 : index
    %c0_2 = arith.constant 0 : index
    %1 = vector.load %arg2[%c0_1, %c0_2] : memref<128x128xbf16, #tpu.memory_space<vmem>>, vector<128x128xbf16>
    %c0_3 = arith.constant 0 : index
    %c0_4 = arith.constant 0 : index
    %2 = vector.load %arg3[%c0_3, %c0_4] : memref<1x128xf32, #tpu.memory_space<vmem>>, vector<1x128xf32>
    %cst = arith.constant dense<0.000000e+00> : vector<8x128xf32>
    %3 = tpu.matmul %0, %1, %cst {dimension_numbers = #tpu.dot_dimension_numbers<[1], [0], [0], [1], [0, 0, 1, 1], [], []>} : vector<8x128xbf16>, vector<128x128xbf16>, vector<8x128xf32> -> vector<8x128xf32>
    %4 = vector.broadcast %2 : vector<1x128xf32> to vector<8x128xf32>
    %5 = arith.addf %3, %4 : vector<8x128xf32>
    %cst_5 = arith.constant 0.000000e+00 : f32
    %6 = vector.broadcast %cst_5 : f32 to vector<8x128xf32>
    %7 = arith.cmpf ogt, %5, %6 : vector<8x128xf32>
    %cst_6 = arith.constant 0.000000e+00 : f32
    %8 = vector.broadcast %cst_6 : f32 to vector<8x128xf32>
    %9 = arith.minimumf %5, %8 : vector<8x128xf32>
    %10 = math.exp %9 : vector<8x128xf32>
    %cst_7 = arith.constant 1.000000e+00 : f32
    %11 = vector.broadcast %cst_7 : f32 to vector<8x128xf32>
    %12 = arith.subf %10, %11 : vector<8x128xf32>
    %13 = arith.select %7, %5, %12 : vector<8x128xi1>, vector<8x128xf32>
    %14 = arith.truncf %13 : vector<8x128xf32> to vector<8x128xbf16>
    %c0_8 = arith.constant 0 : index
    %c0_9 = arith.constant 0 : index
    %15 = vector.load %arg4[%c0_8, %c0_9] : memref<128x128xbf16, #tpu.memory_space<vmem>>, vector<128x128xbf16>
    %c0_10 = arith.constant 0 : index
    %c0_11 = arith.constant 0 : index
    %16 = vector.load %arg5[%c0_10, %c0_11] : memref<1x128xf32, #tpu.memory_space<vmem>>, vector<1x128xf32>
    %cst_12 = arith.constant dense<0.000000e+00> : vector<8x128xf32>
    %17 = tpu.matmul %14, %15, %cst_12 {dimension_numbers = #tpu.dot_dimension_numbers<[1], [0], [0], [1], [0, 0, 1, 1], [], []>} : vector<8x128xbf16>, vector<128x128xbf16>, vector<8x128xf32> -> vector<8x128xf32>
    %18 = vector.broadcast %16 : vector<1x128xf32> to vector<8x128xf32>
    %19 = arith.addf %17, %18 : vector<8x128xf32>
    %cst_13 = arith.constant 0.000000e+00 : f32
    %20 = vector.broadcast %cst_13 : f32 to vector<8x128xf32>
    %21 = arith.cmpf ogt, %19, %20 : vector<8x128xf32>
    %cst_14 = arith.constant 0.000000e+00 : f32
    %22 = vector.broadcast %cst_14 : f32 to vector<8x128xf32>
    %23 = arith.minimumf %19, %22 : vector<8x128xf32>
    %24 = math.exp %23 : vector<8x128xf32>
    %cst_15 = arith.constant 1.000000e+00 : f32
    %25 = vector.broadcast %cst_15 : f32 to vector<8x128xf32>
    %26 = arith.subf %24, %25 : vector<8x128xf32>
    %27 = arith.select %21, %19, %26 : vector<8x128xi1>, vector<8x128xf32>
    %28 = arith.truncf %27 : vector<8x128xf32> to vector<8x128xbf16>
    %c0_16 = arith.constant 0 : index
    %c0_17 = arith.constant 0 : index
    %29 = vector.load %arg6[%c0_16, %c0_17] : memref<128x128xbf16, #tpu.memory_space<vmem>>, vector<128x128xbf16>
    %c0_18 = arith.constant 0 : index
    %c0_19 = arith.constant 0 : index
    %30 = vector.load %arg7[%c0_18, %c0_19] : memref<1x128xf32, #tpu.memory_space<vmem>>, vector<1x128xf32>
    %cst_20 = arith.constant dense<0.000000e+00> : vector<8x128xf32>
    %31 = tpu.matmul %28, %29, %cst_20 {dimension_numbers = #tpu.dot_dimension_numbers<[1], [0], [0], [1], [0, 0, 1, 1], [], []>} : vector<8x128xbf16>, vector<128x128xbf16>, vector<8x128xf32> -> vector<8x128xf32>
    %32 = vector.broadcast %30 : vector<1x128xf32> to vector<8x128xf32>
    %33 = arith.addf %31, %32 : vector<8x128xf32>
    %34 = tpu.transpose %33, [1, 0] : vector<8x128xf32> -> vector<128x8xf32>
    %35 = vector.extract_strided_slice %34 {offsets = [0, 0], sizes = [8, 8], strides = [1, 1]} : vector<128x8xf32> to vector<8x8xf32>
    %c0_21 = arith.constant 0 : index
    %c0_22 = arith.constant 0 : index
    %36 = vector.load %arg8[%c0_21, %c0_22] : memref<8x8xf32, #tpu.memory_space<vmem>>, vector<8x8xf32>
    tpu.vector_store %arg8[%c0_21, %c0_22], %35 {strides = array<i32>} : memref<8x8xf32, #tpu.memory_space<vmem>>, vector<8x8xf32>,
    return
  }
  func.func @transform_0(%arg0: i32) -> (i32, i32) {
    %c0_i32 = arith.constant 0 : i32
    %c0_i32_0 = arith.constant 0 : i32
    return %arg0, %c0_i32 : i32, i32
  }
  func.func @transform_1(%arg0: i32) -> (i32, i32) {
    %c0_i32 = arith.constant 0 : i32
    %c0_i32_0 = arith.constant 0 : i32
    %c0_i32_1 = arith.constant 0 : i32
    return %c0_i32, %c0_i32_0 : i32, i32
  }
  func.func @transform_2(%arg0: i32) -> (i32, i32) {
    %c0_i32 = arith.constant 0 : i32
    %c0_i32_0 = arith.constant 0 : i32
    %c0_i32_1 = arith.constant 0 : i32
    return %c0_i32, %c0_i32_0 : i32, i32
  }
  func.func @transform_3(%arg0: i32) -> (i32, i32) {
    %c0_i32 = arith.constant 0 : i32
    %c0_i32_0 = arith.constant 0 : i32
    %c0_i32_1 = arith.constant 0 : i32
    return %c0_i32, %c0_i32_0 : i32, i32
  }
  func.func @transform_4(%arg0: i32) -> (i32, i32) {
    %c0_i32 = arith.constant 0 : i32
    %c0_i32_0 = arith.constant 0 : i32
    %c0_i32_1 = arith.constant 0 : i32
    return %c0_i32, %c0_i32_0 : i32, i32
  }
  func.func @transform_5(%arg0: i32) -> (i32, i32) {
    %c0_i32 = arith.constant 0 : i32
    %c0_i32_0 = arith.constant 0 : i32
    %c0_i32_1 = arith.constant 0 : i32
    return %c0_i32, %c0_i32_0 : i32, i32
  }
  func.func @transform_6(%arg0: i32) -> (i32, i32) {
    %c0_i32 = arith.constant 0 : i32
    %c0_i32_0 = arith.constant 0 : i32
    %c0_i32_1 = arith.constant 0 : i32
    return %c0_i32, %c0_i32_0 : i32, i32
  }
  func.func @transform_7(%arg0: i32) -> (i32, i32) {
    %c0_i32 = arith.constant 0 : i32
    %c0_i32_0 = arith.constant 0 : i32
    return %arg0, %c0_i32 : i32, i32
  }
}

module attributes {stable_mosaic.version = 11 : i64} {
  func.func @_fused_mlp_kernel(%arg0: i32, %arg1: memref<8x128xbf16, #tpu.memory_space<vmem>>, %arg2: memref<128x128xbf16, #tpu.memory_space<vmem>>, %arg3: memref<1x128xf32, #tpu.memory_space<vmem>>, %arg4: memref<128x128xbf16, #tpu.memory_space<vmem>>, %arg5: memref<1x128xf32, #tpu.memory_space<vmem>>, %arg6: memref<128x128xbf16, #tpu.memory_space<vmem>>, %arg7: memref<1x128xf32, #tpu.memory_space<vmem>>, %arg8: memref<8x8xf32, #tpu.memory_space<vmem>>) attributes {dimension_semantics = [#tpu.dimension_semantics<parallel>], iteration_bounds = array<i64: 1>, scalar_prefetch = 0 : i64, scratch_operands = 0 : i64, tpu.core_type = #tpu.core_type<tc>, window_params = [{transform_indices = @transform_0, window_bounds = array<i64: 8, 128>}, {pipeline_mode = #tpu.pipeline_mode<synchronous>, transform_indices = @transform_1, window_bounds = array<i64: 128, 128>}, {pipeline_mode = #tpu.pipeline_mode<synchronous>, transform_indices = @transform_2, window_bounds = array<i64: 1, 128>}, {pipeline_mode = #tpu.pipeline_mode<synchronous>, transform_indices = @transform_3, window_bounds = array<i64: 128, 128>}, {pipeline_mode = #tpu.pipeline_mode<synchronous>, transform_indices = @transform_4, window_bounds = array<i64: 1, 128>}, {pipeline_mode = #tpu.pipeline_mode<synchronous>, transform_indices = @transform_5, window_bounds = array<i64: 128, 128>}, {pipeline_mode = #tpu.pipeline_mode<synchronous>, transform_indices = @transform_6, window_bounds = array<i64: 1, 128>}, {transform_indices = @transform_7, window_bounds = array<i64: 8, 8>}]} {
    %c0 = arith.constant 0 : index
    %c0_0 = arith.constant 0 : index
    %0 = vector.load %arg1[%c0, %c0_0] : memref<8x128xbf16, #tpu.memory_space<vmem>>, vector<8x128xbf16>
    %c0_1 = arith.constant 0 : index
    %c0_2 = arith.constant 0 : index
    %1 = vector.load %arg2[%c0_1, %c0_2] : memref<128x128xbf16, #tpu.memory_space<vmem>>, vector<128x128xbf16>
    %c0_3 = arith.constant 0 : index
    %c0_4 = arith.constant 0 : index
    %2 = vector.load %arg3[%c0_3, %c0_4] : memref<1x128xf32, #tpu.memory_space<vmem>>, vector<1x128xf32>
    %cst = arith.constant dense<0.000000e+00> : vector<8x128xf32>
    %3 = tpu.matmul %0, %1, %cst {dimension_numbers = #tpu.dot_dimension_numbers<[1], [0], [0], [1], [0, 0, 1, 1], [], []>} : vector<8x128xbf16>, vector<128x128xbf16>, vector<8x128xf32> -> vector<8x128xf32>
    %4 = vector.broadcast %2 : vector<1x128xf32> to vector<8x128xf32>
    %5 = arith.addf %3, %4 : vector<8x128xf32>
    %cst_5 = arith.constant 0.000000e+00 : f32
    %6 = vector.broadcast %cst_5 : f32 to vector<8x128xf32>
    %7 = arith.cmpf ogt, %5, %6 : vector<8x128xf32>
    %cst_6 = arith.constant 0.000000e+00 : f32
    %8 = vector.broadcast %cst_6 : f32 to vector<8x128xf32>
    %9 = arith.minimumf %5, %8 : vector<8x128xf32>
    %10 = math.exp %9 : vector<8x128xf32>
    %cst_7 = arith.constant 1.000000e+00 : f32
    %11 = vector.broadcast %cst_7 : f32 to vector<8x128xf32>
    %12 = arith.subf %10, %11 : vector<8x128xf32>
    %13 = arith.select %7, %5, %12 : vector<8x128xi1>, vector<8x128xf32>
    %14 = arith.truncf %13 : vector<8x128xf32> to vector<8x128xbf16>
    %c0_8 = arith.constant 0 : index
    %c0_9 = arith.constant 0 : index
    %15 = vector.load %arg4[%c0_8, %c0_9] : memref<128x128xbf16, #tpu.memory_space<vmem>>, vector<128x128xbf16>
    %c0_10 = arith.constant 0 : index
    %c0_11 = arith.constant 0 : index
    %16 = vector.load %arg5[%c0_10, %c0_11] : memref<1x128xf32, #tpu.memory_space<vmem>>, vector<1x128xf32>
    %cst_12 = arith.constant dense<0.000000e+00> : vector<8x128xf32>
    %17 = tpu.matmul %14, %15, %cst_12 {dimension_numbers = #tpu.dot_dimension_numbers<[1], [0], [0], [1], [0, 0, 1, 1], [], []>} : vector<8x128xbf16>, vector<128x128xbf16>, vector<8x128xf32> -> vector<8x128xf32>
    %18 = vector.broadcast %16 : vector<1x128xf32> to vector<8x128xf32>
    %19 = arith.addf %17, %18 : vector<8x128xf32>
    %cst_13 = arith.constant 0.000000e+00 : f32
    %20 = vector.broadcast %cst_13 : f32 to vector<8x128xf32>
    %21 = arith.cmpf ogt, %19, %20 : vector<8x128xf32>
    %cst_14 = arith.constant 0.000000e+00 : f32
    %22 = vector.broadcast %cst_14 : f32 to vector<8x128xf32>
    %23 = arith.minimumf %19, %22 : vector<8x128xf32>
    %24 = math.exp %23 : vector<8x128xf32>
    %cst_15 = arith.constant 1.000000e+00 : f32
    %25 = vector.broadcast %cst_15 : f32 to vector<8x128xf32>
    %26 = arith.subf %24, %25 : vector<8x128xf32>
    %27 = arith.select %21, %19, %26 : vector<8x128xi1>, vector<8x128xf32>
    %28 = arith.truncf %27 : vector<8x128xf32> to vector<8x128xbf16>
    %c0_16 = arith.constant 0 : index
    %c0_17 = arith.constant 0 : index
    %29 = vector.load %arg6[%c0_16, %c0_17] : memref<128x128xbf16, #tpu.memory_space<vmem>>, vector<128x128xbf16>
    %c0_18 = arith.constant 0 : index
    %c0_19 = arith.constant 0 : index
    %30 = vector.load %arg7[%c0_18, %c0_19] : memref<1x128xf32, #tpu.memory_space<vmem>>, vector<1x128xf32>
    %cst_20 = arith.constant dense<0.000000e+00> : vector<8x128xf32>
    %31 = tpu.matmul %28, %29, %cst_20 {dimension_numbers = #tpu.dot_dimension_numbers<[1], [0], [0], [1], [0, 0, 1, 1], [], []>} : vector<8x128xbf16>, vector<128x128xbf16>, vector<8x128xf32> -> vector<8x128xf32>
    %32 = vector.broadcast %30 : vector<1x128xf32> to vector<8x128xf32>
    %33 = arith.addf %31, %32 : vector<8x128xf32>
    %34 = tpu.transpose %33, [1, 0] : vector<8x128xf32> -> vector<128x8xf32>
    %35 = vector.extract_strided_slice %34 {offsets = [0, 0], sizes = [8, 8], strides = [1, 1]} : vector<128x8xf32> to vector<8x8xf32>
    %c0_21 = arith.constant 0 : index
    %c0_22 = arith.constant 0 : index
    %36 = vector.load %arg8[%c0_21, %c0_22] : memref<8x8xf32, #tpu.memory_space<vmem>>, vector<8x8xf32>
    tpu.vector_store %arg8[%c0_21, %c0_22], %35 {strides = array<i32>} : memref<8x8xf32, #tpu.memory_space<vmem>>, vector<8x8xf32>,
    return
  }
  func.func @transform_0(%arg0: i32) -> (i32, i32) {
    %c0_i32 = arith.constant 0 : i32
    %c0_i32_0 = arith.constant 0 : i32
    return %arg0, %c0_i32 : i32, i32
  }
  func.func @transform_1(%arg0: i32) -> (i32, i32) {
    %c0_i32 = arith.constant 0 : i32
    %c0_i32_0 = arith.constant 0 : i32
    %c0_i32_1 = arith.constant 0 : i32
    return %c0_i32, %c0_i32_0 : i32, i32
  }
  func.func @transform_2(%arg0: i32) -> (i32, i32) {
    %c0_i32 = arith.constant 0 : i32
    %c0_i32_0 = arith.constant 0 : i32
    %c0_i32_1 = arith.constant 0 : i32
    return %c0_i32, %c0_i32_0 : i32, i32
  }
  func.func @transform_3(%arg0: i32) -> (i32, i32) {
    %c0_i32 = arith.constant 0 : i32
    %c0_i32_0 = arith.constant 0 : i32
    %c0_i32_1 = arith.constant 0 : i32
    return %c0_i32, %c0_i32_0 : i32, i32
  }
  func.func @transform_4(%arg0: i32) -> (i32, i32) {
    %c0_i32 = arith.constant 0 : i32
    %c0_i32_0 = arith.constant 0 : i32
    %c0_i32_1 = arith.constant 0 : i32
    return %c0_i32, %c0_i32_0 : i32, i32
  }
  func.func @transform_5(%arg0: i32) -> (i32, i32) {
    %c0_i32 = arith.constant 0 : i32
    %c0_i32_0 = arith.constant 0 : i32
    %c0_i32_1 = arith.constant 0 : i32
    return %c0_i32, %c0_i32_0 : i32, i32
  }
  func.func @transform_6(%arg0: i32) -> (i32, i32) {
    %c0_i32 = arith.constant 0 : i32
    %c0_i32_0 = arith.constant 0 : i32
    %c0_i32_1 = arith.constant 0 : i32
    return %c0_i32, %c0_i32_0 : i32, i32
  }
  func.func @transform_7(%arg0: i32) -> (i32, i32) {
    %c0_i32 = arith.constant 0 : i32
    %c0_i32_0 = arith.constant 0 : i32
    return %arg0, %c0_i32 : i32, i32
  }
}

</mosaic_0001>

<bundles_post_ra>
// kernel: tpu_custom_call.1
= control target key start
LH: loop header
LB: loop body
LE: loop exit
PB: predicated region body
PF: predicated region fallthrough
CT: control target
= control target key end

     0   :  { %12 = vsyncpa [#allocation3], 0  ;;  %s735_s0 = inlined_call_operand.hbm [shape: bf16[8,128], index: 0, kind: input, shape index: {}]   ;;  %s736_s1 = inlined_call_operand.hbm [shape: bf16[128,128], index: 1, kind: input, shape index: {}]   ;;  %s737_s2 = inlined_call_operand.vmem [shape: f32[1,128], index: 2, kind: input, shape index: {}]   ;;  %s738_s3 = inlined_call_operand.hbm [shape: bf16[128,128], index: 3, kind: input, shape index: {}]   ;;  %s739_s4 = inlined_call_operand.vmem [shape: f32[1,128], index: 4, kind: input, shape index: {}]   ;;  %s740_s5 = inlined_call_operand.hbm [shape: bf16[128,128], index: 5, kind: input, shape index: {}]   ;;  %s741_s6 = inlined_call_operand.vmem [shape: f32[1,128], index: 6, kind: input, shape index: {}]   ;;  %s742_s7 = inlined_call_operand.hbm [shape: f32[8,8], index: 7, kind: output, shape index: {}]  }
   0x1   :  { %13 = vsyncpa [#allocation6], 0 }
   0x2   :  { %14 = vsyncpa [#allocation9], 0  ;;  %s31_s26 = sshll.u32 %s736_s1, 4  ;;  %s32_s26 = int_to_ptr.hbm [resolvable:$true] %s31_s26 }
   0x3   :  { %15 = vsyncpa [#allocation4], 0  ;;  %s664_s27 = smov [#allocation5]   ;;  %s21_s8 = sshll.u32 %s735_s0, 4  ;;  %s22_s8 = int_to_ptr.hbm [resolvable:$true] %s21_s8 }
   0x4   :  { %s33_s28 = sshll.u32 %s664_s27, 4  ;;  %s665_s9 = smov 64   ;;  %s34_s28 = int_to_ptr.vmem [resolvable:$true] %s33_s28 }
   0x5   :  { %s666_s10 = smov 4   ;;  %s667_s11 = smov [#allocation2]  }
   0x6   :  { %39 = dma.hbm_to_vmem [thread:$0]  %s32_s26, 1024, %s34_s28, [#allocation6], %s665_s9, %s665_s9, %s666_s10  }
   0x7   :  { %s23_s12 = sshll.u32 %s667_s11, 4  ;;  %s46_s15 = sshll.u32 %s738_s3, 4  ;;  %s24_s12 = int_to_ptr.vmem [resolvable:$true] %s23_s12  ;;  %s47_s15 = int_to_ptr.hbm [resolvable:$true] %s46_s15 }
   0x8   :  { %26 = dma.hbm_to_vmem [thread:$0]  %s22_s8, 64, %s24_s12, [#allocation3]  }
   0x9   :  { %s61_s17 = sshll.u32 %s740_s5, 4  ;;  %s668_s18 = smov [#allocation7]   ;;  %s62_s17 = int_to_ptr.hbm [resolvable:$true] %s61_s17 }
   0xa   :  { %s48_s19 = sshll.u32 %s668_s18, 4  ;;  %s669_s0 = smov [#allocation8]   ;;  %s49_s19 = int_to_ptr.vmem [resolvable:$true] %s48_s19 }
   0xb   :  { %54 = dma.hbm_to_vmem [thread:$0]  %s47_s15, 1024, %s49_s19, [#allocation6], %s665_s9, %s665_s9, %s666_s10  }
   0xc   :  { %s63_s20 = sshll.u32 %s669_s0, 4  ;;  %s64_s20 = int_to_ptr.vmem [resolvable:$true] %s63_s20 }
   0xd   :  { %69 = dma.hbm_to_vmem [thread:$0]  %s62_s17, 1024, %s64_s20, [#allocation9], %s665_s9, %s665_s9, %s666_s10  }
   0xe   :  { %656 = dma.done.wait [#allocation3], 64  }
   0xf   :  { %657 = vsyncadd [#allocation3], 4294967232 }
  0x10   :  { %658 = dma.done.wait [#allocation6], 2048  }
  0x11   :  { %659 = vsyncadd [#allocation6], 4294965248 }
  0x12   :  { %660 = dma.done.wait [#allocation9], 1024  }
  0x13   :  { %661 = vsyncadd [#allocation9], 4294966272  ;;  %v504_v0 = vld [vmem:[#allocation5 + $0x38] sm:$0xff]  ;;  %v503_v1 = vld [vmem:[#allocation5 + $0x30] sm:$0xff]  ;;  %s387_s27 = sshll.u32 %s742_s7, 4  ;;  %vm378_vm2 = vcmask 64512   ;;  %s388_s27 = int_to_ptr.hbm [resolvable:$true] %s387_s27 }
  0x14   :  { %157 = vmatpush.bf16.msra.mxu0 %v504_v0  ;;  %v512_v2 = vld [vmem:[#allocation7 + $0x38] sm:$0xff]  ;;  %v511_v3 = vld [vmem:[#allocation7 + $0x30] sm:$0xff]  ;;  %v502_v4 = vld [vmem:[#allocation5 + $0x28] sm:$0xff] }
  0x15   :  { %245 = vmatpush.bf16.msra.mxu1 %v512_v2  ;;  %v510_v5 = vld [vmem:[#allocation7 + $0x28] sm:$0xff]  ;;  %v501_v6 = vld [vmem:[#allocation5 + $0x20] sm:$0xff]  ;;  %v500_v7 = vld [vmem:[#allocation5 + $0x18] sm:$0xff] }
  0x16   :  { %v499_v8 = vld [vmem:[#allocation5 + $0x10] sm:$0xff]  ;;  %v498_v9 = vld [vmem:[#allocation5 + $0x8] sm:$0xff]  ;;  %v497_v10 = vld [vmem:[#allocation5] sm:$0xff] }
  0x17   :  { %v88_v11 = vld [vmem:[#allocation2] sm:$0xf]  ;;  %v509_v12 = vld [vmem:[#allocation7 + $0x20] sm:$0xff]  ;;  %v507_v14 = vld [vmem:[#allocation7 + $0x10] sm:$0xff] }
  0x18   :  { %158 = vmatpush.bf16.msra.mxu0 %v503_v1  ;;  %v508_v13 = vld [vmem:[#allocation7 + $0x18] sm:$0xff]  ;;  %v506_v15 = vld [vmem:[#allocation7 + $0x8] sm:$0xff]  ;;  %v505_v16 = vld [vmem:[#allocation7] sm:$0xff] }
  0x19   :  { %246 = vmatpush.bf16.msra.mxu1 %v511_v3  ;;  %v520_v17 = vld [vmem:[#allocation8 + $0x38] sm:$0xff]  ;;  %v519_v18 = vld [vmem:[#allocation8 + $0x30] sm:$0xff]  ;;  %v518_v19 = vld [vmem:[#allocation8 + $0x28] sm:$0xff] }
  0x1a   :  { %333 = vmatpush.bf16.msra.mxu2 %v520_v17  ;;  %v529_v20 = vld [vmem:[%s737_s2] ss:$0 sm:$0xff]  ;;  %v517_v30 = vld [vmem:[#allocation8 + $0x20] sm:$0xff]  ;;  %v515_v32 = vld [vmem:[#allocation8 + $0x10] sm:$0xff] }
  0x1b   :  { %v516_v31 = vld [vmem:[#allocation8 + $0x18] sm:$0xff]  ;;  %v514_v33 = vld [vmem:[#allocation8 + $0x8] sm:$0xff]  ;;  %v513_v34 = vld [vmem:[#allocation8] sm:$0xff] }
  0x1c   :  { %159 = vmatpush.bf16.msra.mxu0 %v502_v4  ;;  %v530_v35 = vld [vmem:[%s739_s4] ss:$0 sm:$0xff]  ;;  %s670_s4 = smov [#allocation10]  }
  0x1d   :  { %247 = vmatpush.bf16.msra.mxu1 %v510_v5  ;;  %v531_v45 = vld [vmem:[%s741_s6] ss:$0 sm:$0xff]  ;;  %s385_s24 = sshll.u32 %s670_s4, 4  ;;  %s386_s24 = int_to_ptr.vmem [resolvable:$true] %s385_s24 }
  0x1e   :  { %334 = vmatpush.bf16.msra.mxu2 %v519_v18 }
  0x20   :  { %160 = vmatpush.bf16.msra.mxu0 %v501_v6 }
  0x21   :  { %248 = vmatpush.bf16.msra.mxu1 %v509_v12 }
  0x22   :  { %335 = vmatpush.bf16.msra.mxu2 %v518_v19 }
  0x24   :  { %161 = vmatpush.bf16.msra.mxu0 %v500_v7 }
  0x25   :  { %249 = vmatpush.bf16.msra.mxu1 %v508_v13 }
  0x26   :  { %336 = vmatpush.bf16.msra.mxu2 %v517_v30 }
  0x28   :  { %162 = vmatpush.bf16.msra.mxu0 %v499_v8 }
  0x29   :  { %250 = vmatpush.bf16.msra.mxu1 %v507_v14 }
  0x2a   :  { %337 = vmatpush.bf16.msra.mxu2 %v516_v31 }
  0x2c   :  { %163 = vmatpush.bf16.msra.mxu0 %v498_v9 }
  0x2d   :  { %251 = vmatpush.bf16.msra.mxu1 %v506_v15 }
  0x2e   :  { %338 = vmatpush.bf16.msra.mxu2 %v515_v32 }
  0x30   :  { %164 = vmatpush.bf16.msra.mxu0 %v497_v10 }
  0x31   :  { %252 = vmatpush.bf16.msra.mxu1 %v505_v16 }
  0x32   :  { %339 = vmatpush.bf16.msra.mxu2 %v514_v33 }
  0x33   :  { %165 = vmatmul.bf16.vlgmr.msra.gmra.mxu0 %v88_v11 }
  0x36   :  { %340 = vmatpush.bf16.msra.mxu2 %v513_v34 }
  0xb0   :  { %v166_v21 = vpop.f32.mrf.mxu0 }
  0xb1   :  { %v167_v22 = vadd.f32 %v529_v20, %v166_v21 }
  0xb3   :  { %v171_v23 = vmin.f32 %v167_v22, 0.0  ;;  %vm170_vm0 = vcmp.gt.f32.partialorder %v167_v22, 0.0 }
  0xb5   :  { %v172_v24 = vmul.f32 1.442695, %v171_v23 }
  0xb7   :  { %532 = vpow2.f32 %v172_v24 }
  0xb8   :  { %v168_v25 = vpop.f32.mrf.mxu0 }
  0xbd   :  { %v533_v26 = vpop.eup %532 }
  0xbe   :  { %v431_v27 = vadd.f32 -1.0, %v533_v26 }
  0xc0   :  { %v175_v28 = vsel %vm170_vm0, %v167_v22, %v431_v27 }
  0xc1   :  { %v176_v29 = vpack.c.bf16 %v175_v28, %v175_v28 }
  0xc3   :  { %253 = vmatmul.bf16.vlgmr.msra.gmra.mxu1 %v176_v29 }
 0x140   :  { %v254_v36 = vpop.f32.mrf.mxu1 }
 0x141   :  { %v255_v37 = vadd.f32 %v530_v35, %v254_v36 }
 0x143   :  { %v259_v38 = vmin.f32 %v255_v37, 0.0  ;;  %vm258_vm1 = vcmp.gt.f32.partialorder %v255_v37, 0.0 }
 0x145   :  { %v260_v39 = vmul.f32 1.442695, %v259_v38 }
 0x147   :  { %534 = vpow2.f32 %v260_v39 }
 0x148   :  { %v256_v40 = vpop.f32.mrf.mxu1 }
 0x14d   :  { %v535_v41 = vpop.eup %534 }
 0x14e   :  { %v464_v42 = vadd.f32 -1.0, %v535_v41 }
 0x150   :  { %v263_v43 = vsel %vm258_vm1, %v255_v37, %v464_v42 }
 0x151   :  { %v264_v44 = vpack.c.bf16 %v263_v43, %v263_v43 }
 0x153   :  { %341 = vmatmul.bf16.vlgmr.msra.gmra.mxu2 %v264_v44 }
 0x1d6   :  { %v342_v46 = vpop.f32.mrf.mxu2 }
 0x1d7   :  { %v343_v47 = vadd.f32 %v531_v45, %v342_v46 }
 0x1d9   :  { %346 = vxpose.xlu0.b32.start.end [1/1] (short) (narrow) %v343_v47, 8 }
 0x1de   :  { %v344_v48 = vpop.f32.mrf.mxu2 }
 0x27d   :  { %v362_v49 = vpop.trf.xlu0 }
 0x27e   :  { %379 = vst.msk [vmem:[#allocation10] sm:$0xff] %vm378_vm2, %v362_v49 }
 0x27f   :  { %390 = dma.vmem_to_hbm [thread:$0]  %s386_s24, 128, %s388_s27, [#allocation4]  }
 0x280   :  { %662 = dma.done.wait [#allocation4], 128  }
 0x281   :  { %663 = vsyncadd [#allocation4], 4294967168 }
 0x282   :  { %395 = vsyncpa [#allocation3], 1 }
 0x283   :  { %396 = vsyncpa [#allocation6], 1 }
 0x284   :  { %397 = vsyncpa [#allocation9], 1 }
 0x285   :  { %398 = vsyncpa [#allocation4], 1 }

// kernel: tpu_custom_call.1
= control target key start
LH: loop header
LB: loop body
LE: loop exit
PB: predicated region body
PF: predicated region fallthrough
CT: control target
= control target key end

     0   :  { %12 = vsyncpa [#allocation3], 0  ;;  %s735_s0 = inlined_call_operand.hbm [shape: bf16[8,128], index: 0, kind: input, shape index: {}]   ;;  %s736_s1 = inlined_call_operand.hbm [shape: bf16[128,128], index: 1, kind: input, shape index: {}]   ;;  %s737_s2 = inlined_call_operand.vmem [shape: f32[1,128], index: 2, kind: input, shape index: {}]   ;;  %s738_s3 = inlined_call_operand.hbm [shape: bf16[128,128], index: 3, kind: input, shape index: {}]   ;;  %s739_s4 = inlined_call_operand.vmem [shape: f32[1,128], index: 4, kind: input, shape index: {}]   ;;  %s740_s5 = inlined_call_operand.hbm [shape: bf16[128,128], index: 5, kind: input, shape index: {}]   ;;  %s741_s6 = inlined_call_operand.vmem [shape: f32[1,128], index: 6, kind: input, shape index: {}]   ;;  %s742_s7 = inlined_call_operand.hbm [shape: f32[8,8], index: 7, kind: output, shape index: {}]  }
   0x1   :  { %13 = vsyncpa [#allocation6], 0 }
   0x2   :  { %14 = vsyncpa [#allocation9], 0  ;;  %s31_s26 = sshll.u32 %s736_s1, 4  ;;  %s32_s26 = int_to_ptr.hbm [resolvable:$true] %s31_s26 }
   0x3   :  { %15 = vsyncpa [#allocation4], 0  ;;  %s664_s27 = smov [#allocation5]   ;;  %s21_s8 = sshll.u32 %s735_s0, 4  ;;  %s22_s8 = int_to_ptr.hbm [resolvable:$true] %s21_s8 }
   0x4   :  { %s33_s28 = sshll.u32 %s664_s27, 4  ;;  %s665_s9 = smov 64   ;;  %s34_s28 = int_to_ptr.vmem [resolvable:$true] %s33_s28 }
   0x5   :  { %s666_s10 = smov 4   ;;  %s667_s11 = smov [#allocation2]  }
   0x6   :  { %39 = dma.hbm_to_vmem [thread:$0]  %s32_s26, 1024, %s34_s28, [#allocation6], %s665_s9, %s665_s9, %s666_s10  }
   0x7   :  { %s23_s12 = sshll.u32 %s667_s11, 4  ;;  %s46_s15 = sshll.u32 %s738_s3, 4  ;;  %s24_s12 = int_to_ptr.vmem [resolvable:$true] %s23_s12  ;;  %s47_s15 = int_to_ptr.hbm [resolvable:$true] %s46_s15 }
   0x8   :  { %26 = dma.hbm_to_vmem [thread:$0]  %s22_s8, 64, %s24_s12, [#allocation3]  }
   0x9   :  { %s61_s17 = sshll.u32 %s740_s5, 4  ;;  %s668_s18 = smov [#allocation7]   ;;  %s62_s17 = int_to_ptr.hbm [resolvable:$true] %s61_s17 }
   0xa   :  { %s48_s19 = sshll.u32 %s668_s18, 4  ;;  %s669_s0 = smov [#allocation8]   ;;  %s49_s19 = int_to_ptr.vmem [resolvable:$true] %s48_s19 }
   0xb   :  { %54 = dma.hbm_to_vmem [thread:$0]  %s47_s15, 1024, %s49_s19, [#allocation6], %s665_s9, %s665_s9, %s666_s10  }
   0xc   :  { %s63_s20 = sshll.u32 %s669_s0, 4  ;;  %s64_s20 = int_to_ptr.vmem [resolvable:$true] %s63_s20 }
   0xd   :  { %69 = dma.hbm_to_vmem [thread:$0]  %s62_s17, 1024, %s64_s20, [#allocation9], %s665_s9, %s665_s9, %s666_s10  }
   0xe   :  { %656 = dma.done.wait [#allocation3], 64  }
   0xf   :  { %657 = vsyncadd [#allocation3], 4294967232 }
  0x10   :  { %658 = dma.done.wait [#allocation6], 2048  }
  0x11   :  { %659 = vsyncadd [#allocation6], 4294965248 }
  0x12   :  { %660 = dma.done.wait [#allocation9], 1024  }
  0x13   :  { %661 = vsyncadd [#allocation9], 4294966272  ;;  %v504_v0 = vld [vmem:[#allocation5 + $0x38] sm:$0xff]  ;;  %v503_v1 = vld [vmem:[#allocation5 + $0x30] sm:$0xff]  ;;  %s387_s27 = sshll.u32 %s742_s7, 4  ;;  %vm378_vm2 = vcmask 64512   ;;  %s388_s27 = int_to_ptr.hbm [resolvable:$true] %s387_s27 }
  0x14   :  { %157 = vmatpush.bf16.msra.mxu0 %v504_v0  ;;  %v512_v2 = vld [vmem:[#allocation7 + $0x38] sm:$0xff]  ;;  %v511_v3 = vld [vmem:[#allocation7 + $0x30] sm:$0xff]  ;;  %v502_v4 = vld [vmem:[#allocation5 + $0x28] sm:$0xff] }
  0x15   :  { %245 = vmatpush.bf16.msra.mxu1 %v512_v2  ;;  %v510_v5 = vld [vmem:[#allocation7 + $0x28] sm:$0xff]  ;;  %v501_v6 = vld [vmem:[#allocation5 + $0x20] sm:$0xff]  ;;  %v500_v7 = vld [vmem:[#allocation5 + $0x18] sm:$0xff] }
  0x16   :  { %v499_v8 = vld [vmem:[#allocation5 + $0x10] sm:$0xff]  ;;  %v498_v9 = vld [vmem:[#allocation5 + $0x8] sm:$0xff]  ;;  %v497_v10 = vld [vmem:[#allocation5] sm:$0xff] }
  0x17   :  { %v88_v11 = vld [vmem:[#allocation2] sm:$0xf]  ;;  %v509_v12 = vld [vmem:[#allocation7 + $0x20] sm:$0xff]  ;;  %v507_v14 = vld [vmem:[#allocation7 + $0x10] sm:$0xff] }
  0x18   :  { %158 = vmatpush.bf16.msra.mxu0 %v503_v1  ;;  %v508_v13 = vld [vmem:[#allocation7 + $0x18] sm:$0xff]  ;;  %v506_v15 = vld [vmem:[#allocation7 + $0x8] sm:$0xff]  ;;  %v505_v16 = vld [vmem:[#allocation7] sm:$0xff] }
  0x19   :  { %246 = vmatpush.bf16.msra.mxu1 %v511_v3  ;;  %v520_v17 = vld [vmem:[#allocation8 + $0x38] sm:$0xff]  ;;  %v519_v18 = vld [vmem:[#allocation8 + $0x30] sm:$0xff]  ;;  %v518_v19 = vld [vmem:[#allocation8 + $0x28] sm:$0xff] }
  0x1a   :  { %333 = vmatpush.bf16.msra.mxu2 %v520_v17  ;;  %v529_v20 = vld [vmem:[%s737_s2] ss:$0 sm:$0xff]  ;;  %v517_v30 = vld [vmem:[#allocation8 + $0x20] sm:$0xff]  ;;  %v515_v32 = vld [vmem:[#allocation8 + $0x10] sm:$0xff] }
  0x1b   :  { %v516_v31 = vld [vmem:[#allocation8 + $0x18] sm:$0xff]  ;;  %v514_v33 = vld [vmem:[#allocation8 + $0x8] sm:$0xff]  ;;  %v513_v34 = vld [vmem:[#allocation8] sm:$0xff] }
  0x1c   :  { %159 = vmatpush.bf16.msra.mxu0 %v502_v4  ;;  %v530_v35 = vld [vmem:[%s739_s4] ss:$0 sm:$0xff]  ;;  %s670_s4 = smov [#allocation10]  }
  0x1d   :  { %247 = vmatpush.bf16.msra.mxu1 %v510_v5  ;;  %v531_v45 = vld [vmem:[%s741_s6] ss:$0 sm:$0xff]  ;;  %s385_s24 = sshll.u32 %s670_s4, 4  ;;  %s386_s24 = int_to_ptr.vmem [resolvable:$true] %s385_s24 }
  0x1e   :  { %334 = vmatpush.bf16.msra.mxu2 %v519_v18 }
  0x20   :  { %160 = vmatpush.bf16.msra.mxu0 %v501_v6 }
  0x21   :  { %248 = vmatpush.bf16.msra.mxu1 %v509_v12 }
  0x22   :  { %335 = vmatpush.bf16.msra.mxu2 %v518_v19 }
  0x24   :  { %161 = vmatpush.bf16.msra.mxu0 %v500_v7 }
  0x25   :  { %249 = vmatpush.bf16.msra.mxu1 %v508_v13 }
  0x26   :  { %336 = vmatpush.bf16.msra.mxu2 %v517_v30 }
  0x28   :  { %162 = vmatpush.bf16.msra.mxu0 %v499_v8 }
  0x29   :  { %250 = vmatpush.bf16.msra.mxu1 %v507_v14 }
  0x2a   :  { %337 = vmatpush.bf16.msra.mxu2 %v516_v31 }
  0x2c   :  { %163 = vmatpush.bf16.msra.mxu0 %v498_v9 }
  0x2d   :  { %251 = vmatpush.bf16.msra.mxu1 %v506_v15 }
  0x2e   :  { %338 = vmatpush.bf16.msra.mxu2 %v515_v32 }
  0x30   :  { %164 = vmatpush.bf16.msra.mxu0 %v497_v10 }
  0x31   :  { %252 = vmatpush.bf16.msra.mxu1 %v505_v16 }
  0x32   :  { %339 = vmatpush.bf16.msra.mxu2 %v514_v33 }
  0x33   :  { %165 = vmatmul.bf16.vlgmr.msra.gmra.mxu0 %v88_v11 }
  0x36   :  { %340 = vmatpush.bf16.msra.mxu2 %v513_v34 }
  0xb0   :  { %v166_v21 = vpop.f32.mrf.mxu0 }
  0xb1   :  { %v167_v22 = vadd.f32 %v529_v20, %v166_v21 }
  0xb3   :  { %v171_v23 = vmin.f32 %v167_v22, 0.0  ;;  %vm170_vm0 = vcmp.gt.f32.partialorder %v167_v22, 0.0 }
  0xb5   :  { %v172_v24 = vmul.f32 1.442695, %v171_v23 }
  0xb7   :  { %532 = vpow2.f32 %v172_v24 }
  0xb8   :  { %v168_v25 = vpop.f32.mrf.mxu0 }
  0xbd   :  { %v533_v26 = vpop.eup %532 }
  0xbe   :  { %v431_v27 = vadd.f32 -1.0, %v533_v26 }
  0xc0   :  { %v175_v28 = vsel %vm170_vm0, %v167_v22, %v431_v27 }
  0xc1   :  { %v176_v29 = vpack.c.bf16 %v175_v28, %v175_v28 }
  0xc3   :  { %253 = vmatmul.bf16.vlgmr.msra.gmra.mxu1 %v176_v29 }
 0x140   :  { %v254_v36 = vpop.f32.mrf.mxu1 }
 0x141   :  { %v255_v37 = vadd.f32 %v530_v35, %v254_v36 }
 0x143   :  { %v259_v38 = vmin.f32 %v255_v37, 0.0  ;;  %vm258_vm1 = vcmp.gt.f32.partialorder %v255_v37, 0.0 }
 0x145   :  { %v260_v39 = vmul.f32 1.442695, %v259_v38 }
 0x147   :  { %534 = vpow2.f32 %v260_v39 }
 0x148   :  { %v256_v40 = vpop.f32.mrf.mxu1 }
 0x14d   :  { %v535_v41 = vpop.eup %534 }
 0x14e   :  { %v464_v42 = vadd.f32 -1.0, %v535_v41 }
 0x150   :  { %v263_v43 = vsel %vm258_vm1, %v255_v37, %v464_v42 }
 0x151   :  { %v264_v44 = vpack.c.bf16 %v263_v43, %v263_v43 }
 0x153   :  { %341 = vmatmul.bf16.vlgmr.msra.gmra.mxu2 %v264_v44 }
 0x1d6   :  { %v342_v46 = vpop.f32.mrf.mxu2 }
 0x1d7   :  { %v343_v47 = vadd.f32 %v531_v45, %v342_v46 }
 0x1d9   :  { %346 = vxpose.xlu0.b32.start.end [1/1] (short) (narrow) %v343_v47, 8 }
 0x1de   :  { %v344_v48 = vpop.f32.mrf.mxu2 }
 0x27d   :  { %v362_v49 = vpop.trf.xlu0 }
 0x27e   :  { %379 = vst.msk [vmem:[#allocation10] sm:$0xff] %vm378_vm2, %v362_v49 }
 0x27f   :  { %390 = dma.vmem_to_hbm [thread:$0]  %s386_s24, 128, %s388_s27, [#allocation4]  }
 0x280   :  { %662 = dma.done.wait [#allocation4], 128  }
 0x281   :  { %663 = vsyncadd [#allocation4], 4294967168 }
 0x282   :  { %395 = vsyncpa [#allocation3], 1 }
 0x283   :  { %396 = vsyncpa [#allocation6], 1 }
 0x284   :  { %397 = vsyncpa [#allocation9], 1 }
 0x285   :  { %398 = vsyncpa [#allocation4], 1 }

</bundles_post_ra>
